<compile_context>
chip_gen: v6e
topology: v6e:2x2x1
jax: 0.10.0
libtpu: 0.0.40
codegen_flags: <defaults>
</compile_context>

<pallas_src>
import functools

import jax
import jax.numpy as jnp
from jax import lax
from jax.experimental import pallas as pl
from jax.experimental.pallas import tpu as pltpu


# ---------------------------------------------------------------------------
# helpers
# ---------------------------------------------------------------------------
def _round_up(x, m):
    return (x + m - 1) // m * m


def _pick_tile(default, dim):
    """Largest power-of-two multiple of 128 that is <= default and <= padded dim."""
    cap = max(128, min(default, _round_up(dim, 128)))
    t = 128
    while t * 2 <= cap:
        t *= 2
    return t


def _pad2d(x, rows, cols):
    r, c = x.shape
    if r == rows and c == cols:
        return x
    return jnp.pad(x, ((0, rows - r), (0, cols - c)))


# ---------------------------------------------------------------------------
# Fused kernel: out = LeakyReLU( adj @ (adj^T @ embs) ) in ONE pallas_call
# ---------------------------------------------------------------------------
def _hgcn_fused_kernel(adj_ref, embs_ref, o_ref, mid_ref, midc_ref, *,
                       negative_slope, apply_act):
    p = pl.program_id(0)   # phase: 0 = accumulate mid, 1 = produce output
    i = pl.program_id(1)   # row-tile index over the node axis

    @pl.when((p == 0) & (i == 0))
    def _():
        mid_ref[...] = jnp.zeros_like(mid_ref)

    @pl.when(p == 0)
    def _():
        # mid += adj_tile^T @ embs_tile   (contract the node axis on-chip)
        mid_ref[...] += lax.dot_general(
            adj_ref[...], embs_ref[...],
            dimension_numbers=(((0,), (0,)), ((), ())),
            preferred_element_type=jnp.float32,
        )

    @pl.when((p == 1) & (i == 0))
    def _():
        # One-time downcast of the resident accumulator; hoisted out of the
        # phase-1 loop so the full [E, D] cast is not repeated per row tile.
        midc_ref[...] = mid_ref[...].astype(midc_ref.dtype)

    @pl.when(p == 1)
    def _():
        acc = jnp.dot(adj_ref[...], midc_ref[...],
                      preferred_element_type=jnp.float32)
        if apply_act:
            acc = jnp.where(acc >= 0, acc, acc * negative_slope)
        o_ref[...] = acc.astype(o_ref.dtype)


def _hgcn_fused(adj, embs, *, negative_slope, apply_act, tm, vmem_limit_bytes):
    N, E = adj.shape
    _, D = embs.shape
    Np = _round_up(N, tm)
    Ep = _round_up(E, 128)
    Dp = _round_up(D, 128)
    adj_p = _pad2d(adj, Np, Ep)
    embs_p = _pad2d(embs, Np, Dp)
    n_tiles = Np // tm

    kernel = functools.partial(_hgcn_fused_kernel,
                               negative_slope=negative_slope,
                               apply_act=apply_act)

    out = pl.pallas_call(
        kernel,
        out_shape=jax.ShapeDtypeStruct((Np, Dp), jnp.float32),
        grid_spec=pltpu.PrefetchScalarGridSpec(
            num_scalar_prefetch=0,
            grid=(2, n_tiles),
            in_specs=[
                # adj row tiles: streamed in both phases.
                pl.BlockSpec((tm, Ep), lambda p, i: (i, 0)),
                # embs row tiles: only used in phase 0; pin to block 0 in
                # phase 1 so no redundant HBM reads happen there.
                pl.BlockSpec((tm, Dp), lambda p, i: (i * (1 - p), 0)),
            ],
            # Output only produced in phase 1; pin to block 0 during phase 0
            # so nothing is written back before real data exists.
            out_specs=pl.BlockSpec((tm, Dp), lambda p, i: (i * p, 0)),
            scratch_shapes=[
                pltpu.VMEM((Ep, Dp), jnp.float32),   # f32 accumulator
                pltpu.VMEM((Ep, Dp), adj_p.dtype),   # bf16 copy for phase 1
            ],
        ),
        compiler_params=pltpu.CompilerParams(
            # Both axes must run sequentially: the resident `mid` accumulator
            # needs every row tile before phase 1 can start.
            dimension_semantics=("arbitrary", "arbitrary"),
            vmem_limit_bytes=int(vmem_limit_bytes),
        ),
        cost_estimate=pl.CostEstimate(
            flops=4 * Np * Ep * Dp,
            transcendentals=0,
            bytes_accessed=int(2 * Np * Ep * adj_p.dtype.itemsize
                               + Np * Dp * embs_p.dtype.itemsize
                               + Np * Dp * 4),
        ),
    )(adj_p, embs_p)
    return out[:N, :D]


# ---------------------------------------------------------------------------
# Fallback path: two tiled matmuls (transpose still done on-chip)
# ---------------------------------------------------------------------------
def _matmul_at_b_kernel(a_ref, b_ref, o_ref, acc_ref):
    """C = A^T @ B.  A tile is (tk, tm); contraction over the leading axis."""
    k = pl.program_id(2)

    @pl.when(k == 0)
    def _():
        acc_ref[...] = jnp.zeros_like(acc_ref)

    acc_ref[...] += lax.dot_general(
        a_ref[...], b_ref[...],
        dimension_numbers=(((0,), (0,)), ((), ())),
        preferred_element_type=jnp.float32,
    )

    @pl.when(k == pl.num_programs(2) - 1)
    def _():
        o_ref[...] = acc_ref[...].astype(o_ref.dtype)


def matmul_at_b(a, b, *, out_dtype=jnp.bfloat16, tm=256, tn=256, tk=512):
    """C = A^T @ B with A given untransposed ([K, M]); no host-side A.T."""
    K, M = a.shape
    K2, N = b.shape
    assert K == K2, (a.shape, b.shape)
    tm = _pick_tile(tm, M)
    tn = _pick_tile(tn, N)
    tk = _pick_tile(tk, K)
    Mp, Nq, Kp = _round_up(M, tm), _round_up(N, tn), _round_up(K, tk)
    a = _pad2d(a, Kp, Mp)
    b = _pad2d(b, Kp, Nq)

    out = pl.pallas_call(
        _matmul_at_b_kernel,
        out_shape=jax.ShapeDtypeStruct((Mp, Nq), out_dtype),
        grid_spec=pltpu.PrefetchScalarGridSpec(
            num_scalar_prefetch=0,
            grid=(Mp // tm, Nq // tn, Kp // tk),
            in_specs=[
                pl.BlockSpec((tk, tm), lambda i, j, k: (k, i)),
                pl.BlockSpec((tk, tn), lambda i, j, k: (k, j)),
            ],
            out_specs=pl.BlockSpec((tm, tn), lambda i, j, k: (i, j)),
            scratch_shapes=[pltpu.VMEM((tm, tn), jnp.float32)],
        ),
        compiler_params=pltpu.CompilerParams(
            dimension_semantics=("parallel", "parallel", "arbitrary")),
        cost_estimate=pl.CostEstimate(
            flops=2 * Mp * Nq * Kp,
            transcendentals=0,
            bytes_accessed=int(Kp * Mp * a.dtype.itemsize
                               + Kp * Nq * b.dtype.itemsize
                               + Mp * Nq * jnp.dtype(out_dtype).itemsize),
        ),
    )(a, b)
    return out[:M, :N]


def _matmul_ab_kernel(a_ref, b_ref, o_ref, acc_ref, *, negative_slope, apply_act):
    k = pl.program_id(2)

    @pl.when(k == 0)
    def _():
        acc_ref[...] = jnp.zeros_like(acc_ref)

    acc_ref[...] += jnp.dot(a_ref[...], b_ref[...],
                            preferred_element_type=jnp.float32)

    @pl.when(k == pl.num_programs(2) - 1)
    def _():
        acc = acc_ref[...]
        if apply_act:
            acc = jnp.where(acc >= 0, acc, acc * negative_slope)
        o_ref[...] = acc.astype(o_ref.dtype)


def matmul_ab(a, b, *, negative_slope=0.2, apply_act=False,
              out_dtype=jnp.float32, tm=256, tn=256, tk=512):
    """C = A @ B with optional fused LeakyReLU epilogue."""
    M, K = a.shape
    K2, N = b.shape
    assert K == K2, (a.shape, b.shape)
    tm = _pick_tile(tm, M)
    tn = _pick_tile(tn, N)
    tk = _pick_tile(tk, K)
    Mp, Nq, Kp = _round_up(M, tm), _round_up(N, tn), _round_up(K, tk)
    a = _pad2d(a, Mp, Kp)
    b = _pad2d(b, Kp, Nq)

    kernel = functools.partial(_matmul_ab_kernel,
                               negative_slope=negative_slope,
                               apply_act=apply_act)
    out = pl.pallas_call(
        kernel,
        out_shape=jax.ShapeDtypeStruct((Mp, Nq), out_dtype),
        grid_spec=pltpu.PrefetchScalarGridSpec(
            num_scalar_prefetch=0,
            grid=(Mp // tm, Nq // tn, Kp // tk),
            in_specs=[
                pl.BlockSpec((tm, tk), lambda i, j, k: (i, k)),
                pl.BlockSpec((tk, tn), lambda i, j, k: (k, j)),
            ],
            out_specs=pl.BlockSpec((tm, tn), lambda i, j, k: (i, j)),
            scratch_shapes=[pltpu.VMEM((tm, tn), jnp.float32)],
        ),
        compiler_params=pltpu.CompilerParams(
            dimension_semantics=("parallel", "parallel", "arbitrary")),
        cost_estimate=pl.CostEstimate(
            flops=2 * Mp * Nq * Kp,
            transcendentals=0,
            bytes_accessed=int(Mp * Kp * a.dtype.itemsize
                               + Kp * Nq * b.dtype.itemsize
                               + Mp * Nq * jnp.dtype(out_dtype).itemsize),
        ),
    )(a, b)
    return out[:M, :N]


# ---------------------------------------------------------------------------
# HGCNConv forward
# ---------------------------------------------------------------------------
def _fused_footprint(t, Ep, Dp, itm):
    """Total VMEM bytes of the fused kernel for row tile t."""
    return (Ep * Dp * 4                 # resident f32 `mid` accumulator
            + Ep * Dp * itm             # resident bf16 copy of `mid`
            + 2 * t * Ep * itm          # double-buffered adj row tiles
            + 2 * t * Dp * itm          # double-buffered embs row tiles
            + 2 * t * Dp * 4)           # double-buffered f32 out tiles


def _choose_row_tile(N, Ep, Dp, itm, budget):
    """Largest row tile in {1024,512,256,128} whose footprint fits `budget`."""
    Np = _round_up(N, 128)
    for t in (1024, 512, 256, 128):
        if t > Np and t != 128:
            continue
        fp = _fused_footprint(t, Ep, Dp, itm)
        if fp <= budget:
            return t, fp
    return None, _fused_footprint(128, Ep, Dp, itm)


def hgcn_conv(adj, embs, *, leaky=0.2, act=True,
              tm=256, tn=256, tk=512,
              compute_dtype=jnp.bfloat16,
              fused_vmem_limit_bytes=32 * 1024 * 1024):
    """(LeakyReLU)( adj @ (adj.T @ embs) ).  adj: [N, E], embs: [N, D] -> [N, D] f32."""
    N, E = adj.shape
    N2, D = embs.shape
    assert N == N2, (adj.shape, embs.shape)

    # bf16 inputs: adj is 0/1 (exact); embs quantization is well within GNN
    # tolerance.  Accumulation stays f32; output stays f32.
    adj_c = adj.astype(compute_dtype)
    embs_c = embs.astype(compute_dtype)

    Ep = _round_up(E, 128)
    Dp = _round_up(D, 128)
    itm = jnp.dtype(compute_dtype).itemsize

    t_row, fused_bytes = _choose_row_tile(N, Ep, Dp, itm, fused_vmem_limit_bytes)

    if t_row is not None:
        # Single kernel: no adj.T materialization, no HBM round-trip of mid.
        # Keep the requested scoped-VMEM limit below the smallest physical
        # VMEM across chips (64 MiB on v7x) with headroom for compiler scratch.
        vmem_limit = min(fused_bytes + (8 << 20), 48 << 20)
        return _hgcn_fused(adj_c, embs_c, negative_slope=leaky, apply_act=act,
                           tm=t_row, vmem_limit_bytes=vmem_limit)

    # Fallback: two pallas matmuls.  adj^T is still formed on-chip and the
    # [E, D] intermediate round-trips HBM in bf16.
    mid = matmul_at_b(adj_c, embs_c, out_dtype=compute_dtype,
                      tm=tm, tn=tn, tk=tk)
    return matmul_ab(adj_c, mid, negative_slope=leaky, apply_act=act,
                     out_dtype=jnp.float32, tm=tm, tn=tn, tk=tk)


# ---------------------------------------------------------------------------
# self-test
# ---------------------------------------------------------------------------
def _reference(adj, embs, leaky, act):
    """bf16-faithful reference (same quantization points as the kernel)."""
    adj_q = adj.astype(jnp.bfloat16).astype(jnp.float32)
    embs_q = embs.astype(jnp.bfloat16).astype(jnp.float32)
    mid = (adj_q.T @ embs_q).astype(jnp.bfloat16).astype(jnp.float32)
    out = adj_q @ mid
    if act:
        out = jnp.where(out >= 0, out, out * leaky)
    return out


if __name__ == "__main__":
    key = jax.random.PRNGKey(0)
    leaky = 0.2

    tests = [
        # (N, E, D, act, fused_vmem_limit_bytes)
        (256, 128, 128, True, 32 * 1024 * 1024),   # fused path, aligned shapes
        (260, 200,  96, True, 32 * 1024 * 1024),   # fused path, padded shapes
        (256, 160, 128, False, 0),                 # forced two-call fallback
    ]

    for idx, (N, E, D, act, limit) in enumerate(tests):
        k_adj, k_emb, key = jax.random.split(key, 3)
        # Synthetic ~5%-dense incidence matrix, materialized densely.
        adj = (jax.random.uniform(k_adj, (N, E)) < 0.05).astype(jnp.float32)
        embs = jax.random.normal(k_emb, (N, D), dtype=jnp.float32)

        run = jax.jit(functools.partial(
            hgcn_conv, leaky=leaky, act=act, fused_vmem_limit_bytes=limit))
        out = jax.block_until_ready(run(adj, embs))

        ref = _reference(adj, embs, leaky, act)
        assert out.shape == (N, D), (out.shape, (N, D))
        assert jnp.allclose(out, ref, atol=5e-2, rtol=5e-2), (
            f"test {idx}: max abs diff {jnp.max(jnp.abs(out - ref)):.5f}")

    print("KERNEL_OK")
</pallas_src>

<mosaic_0001>
module attributes {stable_mosaic.version = 11 : i64} {
  func.func @_hgcn_fused_kernel(%arg0: i32, %arg1: i32, %arg2: memref<256x128xbf16, #tpu.memory_space<vmem>>, %arg3: memref<256x128xbf16, #tpu.memory_space<vmem>>, %arg4: memref<256x128xf32, #tpu.memory_space<vmem>>, %arg5: memref<128x128xf32, #tpu.memory_space<vmem>>, %arg6: memref<128x128xbf16, #tpu.memory_space<vmem>>) attributes {dimension_semantics = [#tpu.dimension_semantics<arbitrary>, #tpu.dimension_semantics<arbitrary>], iteration_bounds = array<i64: 2, 1>, scalar_prefetch = 0 : i64, scratch_operands = 2 : i64, tpu.core_type = #tpu.core_type<tc>, window_params = [{transform_indices = @transform_0, window_bounds = array<i64: 256, 128>}, {transform_indices = @transform_1, window_bounds = array<i64: 256, 128>}, {transform_indices = @transform_2, window_bounds = array<i64: 256, 128>}]} {
    %c0_i32 = arith.constant 0 : i32
    %0 = arith.cmpi eq, %arg0, %c0_i32 : i32
    %c0_i32_0 = arith.constant 0 : i32
    %1 = arith.cmpi eq, %arg1, %c0_i32_0 : i32
    %2 = arith.andi %0, %1 : i1
    %3 = arith.extui %2 : i1 to i32
    %c0_i32_1 = arith.constant 0 : i32
    %4 = arith.cmpi ne, %3, %c0_i32_1 : i32
    scf.if %4 {
      %cst = arith.constant 0.000000e+00 : f32
      %16 = vector.broadcast %cst : f32 to vector<128x128xf32>
      %c0 = arith.constant 0 : index
      %c0_8 = arith.constant 0 : index
      %17 = vector.load %arg5[%c0, %c0_8] : memref<128x128xf32, #tpu.memory_space<vmem>>, vector<128x128xf32>
      tpu.vector_store %arg5[%c0, %c0_8], %16 {strides = array<i32>} : memref<128x128xf32, #tpu.memory_space<vmem>>, vector<128x128xf32>,
    } else {
    }
    %c0_i32_2 = arith.constant 0 : i32
    %5 = arith.cmpi eq, %arg0, %c0_i32_2 : i32
    %6 = arith.extui %5 : i1 to i32
    %c0_i32_3 = arith.constant 0 : i32
    %7 = arith.cmpi ne, %6, %c0_i32_3 : i32
    scf.if %7 {
      %c0 = arith.constant 0 : index
      %c0_8 = arith.constant 0 : index
      %16 = vector.load %arg5[%c0, %c0_8] : memref<128x128xf32, #tpu.memory_space<vmem>>, vector<128x128xf32>
      %c0_9 = arith.constant 0 : index
      %c0_10 = arith.constant 0 : index
      %17 = vector.load %arg2[%c0_9, %c0_10] : memref<256x128xbf16, #tpu.memory_space<vmem>>, vector<256x128xbf16>
      %c0_11 = arith.constant 0 : index
      %c0_12 = arith.constant 0 : index
      %18 = vector.load %arg3[%c0_11, %c0_12] : memref<256x128xbf16, #tpu.memory_space<vmem>>, vector<256x128xbf16>
      %cst = arith.constant dense<0.000000e+00> : vector<128x128xf32>
      %19 = tpu.matmul %17, %18, %cst {dimension_numbers = #tpu.dot_dimension_numbers<[0], [0], [1], [1], [0, 1, 1, 1], [], []>} : vector<256x128xbf16>, vector<256x128xbf16>, vector<128x128xf32> -> vector<128x128xf32>
      %20 = arith.addf %16, %19 : vector<128x128xf32>
      %c0_13 = arith.constant 0 : index
      %c0_14 = arith.constant 0 : index
      %21 = vector.load %arg5[%c0_13, %c0_14] : memref<128x128xf32, #tpu.memory_space<vmem>>, vector<128x128xf32>
      tpu.vector_store %arg5[%c0_13, %c0_14], %20 {strides = array<i32>} : memref<128x128xf32, #tpu.memory_space<vmem>>, vector<128x128xf32>,
    } else {
    }
    %c1_i32 = arith.constant 1 : i32
    %8 = arith.cmpi eq, %arg0, %c1_i32 : i32
    %c0_i32_4 = arith.constant 0 : i32
    %9 = arith.cmpi eq, %arg1, %c0_i32_4 : i32
    %10 = arith.andi %8, %9 : i1
    %11 = arith.extui %10 : i1 to i32
    %c0_i32_5 = arith.constant 0 : i32
    %12 = arith.cmpi ne, %11, %c0_i32_5 : i32
    scf.if %12 {
      %c0 = arith.constant 0 : index
      %c0_8 = arith.constant 0 : index
      %16 = vector.load %arg5[%c0, %c0_8] : memref<128x128xf32, #tpu.memory_space<vmem>>, vector<128x128xf32>
      %17 = arith.truncf %16 : vector<128x128xf32> to vector<128x128xbf16>
      %c0_9 = arith.constant 0 : index
      %c0_10 = arith.constant 0 : index
      %18 = vector.load %arg6[%c0_9, %c0_10] : memref<128x128xbf16, #tpu.memory_space<vmem>>, vector<128x128xbf16>
      tpu.vector_store %arg6[%c0_9, %c0_10], %17 {strides = array<i32>} : memref<128x128xbf16, #tpu.memory_space<vmem>>, vector<128x128xbf16>,
    } else {
    }
    %c1_i32_6 = arith.constant 1 : i32
    %13 = arith.cmpi eq, %arg0, %c1_i32_6 : i32
    %14 = arith.extui %13 : i1 to i32
    %c0_i32_7 = arith.constant 0 : i32
    %15 = arith.cmpi ne, %14, %c0_i32_7 : i32
    scf.if %15 {
      %c0 = arith.constant 0 : index
      %c0_8 = arith.constant 0 : index
      %16 = vector.load %arg2[%c0, %c0_8] : memref<256x128xbf16, #tpu.memory_space<vmem>>, vector<256x128xbf16>
      %c0_9 = arith.constant 0 : index
      %c0_10 = arith.constant 0 : index
      %17 = vector.load %arg6[%c0_9, %c0_10] : memref<128x128xbf16, #tpu.memory_space<vmem>>, vector<128x128xbf16>
      %cst = arith.constant dense<0.000000e+00> : vector<256x128xf32>
      %18 = tpu.matmul %16, %17, %cst {dimension_numbers = #tpu.dot_dimension_numbers<[1], [0], [0], [1], [0, 0, 1, 1], [], []>} : vector<256x128xbf16>, vector<128x128xbf16>, vector<256x128xf32> -> vector<256x128xf32>
      %cst_11 = arith.constant 0.000000e+00 : f32
      %19 = vector.broadcast %cst_11 : f32 to vector<256x128xf32>
      %20 = arith.cmpf oge, %18, %19 : vector<256x128xf32>
      %cst_12 = arith.constant 2.000000e-01 : f32
      %21 = vector.broadcast %cst_12 : f32 to vector<256x128xf32>
      %22 = arith.mulf %18, %21 : vector<256x128xf32>
      %23 = arith.select %20, %18, %22 : vector<256x128xi1>, vector<256x128xf32>
      %c0_13 = arith.constant 0 : index
      %c0_14 = arith.constant 0 : index
      %24 = vector.load %arg4[%c0_13, %c0_14] : memref<256x128xf32, #tpu.memory_space<vmem>>, vector<256x128xf32>
      tpu.vector_store %arg4[%c0_13, %c0_14], %23 {strides = array<i32>} : memref<256x128xf32, #tpu.memory_space<vmem>>, vector<256x128xf32>,
    } else {
    }
    return
  }
  func.func @transform_0(%arg0: i32, %arg1: i32) -> (i32, i32) {
    %c0_i32 = arith.constant 0 : i32
    %c0_i32_0 = arith.constant 0 : i32
    return %arg1, %c0_i32 : i32, i32
  }
  func.func @transform_1(%arg0: i32, %arg1: i32) -> (i32, i32) {
    %c1_i32 = arith.constant 1 : i32
    %0 = arith.subi %c1_i32, %arg0 : i32
    %1 = arith.muli %arg1, %0 : i32
    %c0_i32 = arith.constant 0 : i32
    %c0_i32_0 = arith.constant 0 : i32
    return %1, %c0_i32 : i32, i32
  }
  func.func @transform_2(%arg0: i32, %arg1: i32) -> (i32, i32) {
    %0 = arith.muli %arg1, %arg0 : i32
    %c0_i32 = arith.constant 0 : i32
    %c0_i32_0 = arith.constant 0 : i32
    return %0, %c0_i32 : i32, i32
  }
}

</mosaic_0001>

<bundles_post_ra>
// kernel: hgcn_conv.1
= control target key start
LH: loop header
LB: loop body
LE: loop exit
PB: predicated region body
PF: predicated region fallthrough
CT: control target
= control target key end

     0   :  { %7 = vsyncpa [#allocation5], 0  ;;  %s2021_s0 = inlined_call_operand.vmem [shape: bf16[256,128], index: 0, kind: input, shape index: {}]   ;;  %s2022_s1 = inlined_call_operand.vmem [shape: bf16[256,128], index: 1, kind: input, shape index: {}]   ;;  %s2023_s2 = inlined_call_operand.hbm [shape: f32[256,128], index: 2, kind: output, shape index: {}]  }
   0x1   :  { %9 = vsyncpa [#allocation5 + $0x1], 0  ;;  %s1826_s9 = smov 0   ;;  %s1828_s10 = smov 0  }
   0x2   :  { %s1830_s11 = smov 0  }
   0x3 LB: > { %s1340_s12 = sadd.s32 4294967295, %s1805_s11   ;;  %s1341_s13 = sadd.s32 4294967294, %s1805_s11   ;;  %s1805_s11 = sphi %s1830_s11, %s15_s11   ;;  %s1801_s10 = sphi %s1828_s10, %s2026_s10   ;;  %s1797_s9 = sphi %s1826_s9, %s2025_s9  }
   0x4   : > { %s27_s14 = sadd.s32 1, %s1801_s10  ;;  %p1346_p0 = scmp.ge.s32.totalorder %s1805_s11, 1 }
   0x5   : > { %p29_p1 = scmp.ge.s32.totalorder %s27_s14, 2  ;;  %p149_p2 = scmp.lt.s32.totalorder %s1805_s11, 3 }
   0x7   : > { %s2028_s14 = smov (%p29_p1, %s27_s14), 0  ;;  %p150_p3 = pnand %p1346_p0, %p149_p2 }
   0x8   : > { %p197_p4 = scmp.eq.s32.totalorder (!%p150_p3), %s1797_s9, 0 }
   0x9   : > { %153 = sbr.rel (%p150_p3) target bundleno = 667 (0x29b), region = 28 }
   0xe   : > { %202 = sbr.rel (!%p197_p4) target bundleno = 23 (0x17), region = 32  ;;  %v1807_v0 = vmov (%p197_p4), 0.0  }
   0xf   : > { %203 = vst [vmem:[#allocation2 + $0x30] sm:$0xff] (%p197_p4), %v1807_v0  ;;  %204 = vst [vmem:[#allocation2] sm:$0xff] (%p197_p4), %v1807_v0 }
  0x10   : > { %205 = vst [vmem:[#allocation2 + $0x58] sm:$0xff] (%p197_p4), %v1807_v0  ;;  %206 = vst [vmem:[#allocation2 + $0x18] sm:$0xff] (%p197_p4), %v1807_v0 }
  0x11   : > { %207 = vst [vmem:[#allocation2 + $0x50] sm:$0xff] (%p197_p4), %v1807_v0  ;;  %208 = vst [vmem:[#allocation2 + $0x68] sm:$0xff] (%p197_p4), %v1807_v0 }
  0x12   : > { %209 = vst [vmem:[#allocation2 + $0x8] sm:$0xff] (%p197_p4), %v1807_v0  ;;  %210 = vst [vmem:[#allocation2 + $0x48] sm:$0xff] (%p197_p4), %v1807_v0 }
  0x13   : > { %211 = vst [vmem:[#allocation2 + $0x40] sm:$0xff] %v1807_v0  ;;  %212 = vst [vmem:[#allocation2 + $0x20] sm:$0xff] %v1807_v0 }
  0x14   : > { %213 = vst [vmem:[#allocation2 + $0x10] sm:$0xff] %v1807_v0  ;;  %214 = vst [vmem:[#allocation2 + $0x38] sm:$0xff] %v1807_v0 }
  0x15   : > { %215 = vst [vmem:[#allocation2 + $0x60] sm:$0xff] %v1807_v0  ;;  %216 = vst [vmem:[#allocation2 + $0x70] sm:$0xff] %v1807_v0 }
  0x16   : > { %217 = vst [vmem:[#allocation2 + $0x78] sm:$0xff] %v1807_v0  ;;  %218 = vst [vmem:[#allocation2 + $0x28] sm:$0xff] %v1807_v0 }
  0x17 PF: > { %p1348_p5 = scmp.ne.s32.totalorder %s1797_s9, 0 }
  0x19   : > { %221 = sbr.rel (%p1348_p5) target bundleno = 375 (0x177), region = 36 }
  0x1e   : > { %v1699_v1 = vld [vmem:[%s2021_s0 + $0x40] sm:$0xff]   ;;  %v1701_v3 = vld [vmem:[%s2021_s0 + $0x48] sm:$0xff]   ;;  %v1703_v5 = vld [vmem:[%s2021_s0 + $0x50] sm:$0xff]  }
  0x1f   : > { %v1700_v2 = vld [vmem:[%s2021_s0] sm:$0xff]   ;;  %414 = vxpose.xlu0.c.b16.start [1/8] %v1699_v1, 128  ;;  %v1702_v4 = vld [vmem:[%s2021_s0 + $0x8] sm:$0xff]   ;;  %v1704_v6 = vld [vmem:[%s2021_s0 + $0x10] sm:$0xff]  }
  0x20   : > { %398 = vxpose.xlu1.c.b16.start [1/8] %v1700_v2, 128  ;;  %v1705_v7 = vld [vmem:[%s2021_s0 + $0x58] sm:$0xff]   ;;  %v1707_v9 = vld [vmem:[%s2021_s0 + $0x60] sm:$0xff]   ;;  %v1709_v11 = vld [vmem:[%s2021_s0 + $0x68] sm:$0xff]  }
  0x21   : > { %v1706_v8 = vld [vmem:[%s2021_s0 + $0x18] sm:$0xff]   ;;  %v1708_v10 = vld [vmem:[%s2021_s0 + $0x20] sm:$0xff]   ;;  %v1710_v13 = vld [vmem:[%s2021_s0 + $0x28] sm:$0xff]  }
  0x22   : > { %v1715_v12 = vld [vmem:[%s2022_s1 + $0x78] sm:$0xff]   ;;  %v1717_v15 = vld [vmem:[%s2022_s1 + $0x70] sm:$0xff]   ;;  %v1719_v17 = vld [vmem:[%s2022_s1 + $0x68] sm:$0xff]  }
  0x23   : > { %415 = vxpose.xlu0.c.b16.cont [2/8] %v1701_v3, 128  ;;  %v1716_v14 = vld [vmem:[%s2022_s1 + $0x38] sm:$0xff]   ;;  %1492 = vmatprep.subr.bf16.mxu0 %v1715_v12  ;;  %v1718_v16 = vld [vmem:[%s2022_s1 + $0x30] sm:$0xff]   ;;  %v1720_v20 = vld [vmem:[%s2022_s1 + $0x28] sm:$0xff]  }
  0x24   : > { %399 = vxpose.xlu1.c.b16.cont [2/8] %v1702_v4, 128  ;;  %1493 = vmatpush3.bf16.msra.mxu0 %v1716_v14  ;;  %v1711_v18 = vld [vmem:[%s2021_s0 + $0x70] sm:$0xff]   ;;  %v1721_v21 = vld [vmem:[%s2022_s1 + $0x60] sm:$0xff]   ;;  %v1713_v22 = vld [vmem:[%s2021_s0 + $0x78] sm:$0xff]  }
  0x25   : > { %1494 = vmatprep.subr.bf16.mxu0 %v1717_v15  ;;  %1628 = vmatprep.subr.bf16.mxu1 %v1715_v12  ;;  %v1712_v19 = vld [vmem:[%s2021_s0 + $0x30] sm:$0xff]   ;;  %v1714_v23 = vld [vmem:[%s2021_s0 + $0x38] sm:$0xff]   ;;  %v1722_v24 = vld [vmem:[%s2022_s1 + $0x20] sm:$0xff]  }
  0x26   : > { %1636 = vmatpush3.bf16.msra.mxu1 %v1716_v14  ;;  %v1723_v25 = vld [vmem:[%s2022_s1 + $0x58] sm:$0xff]   ;;  %v1725_v27 = vld [vmem:[%s2022_s1 + $0x50] sm:$0xff]   ;;  %v1727_v29 = vld [vmem:[%s2022_s1 + $0x48] sm:$0xff]  }
  0x27   : > { %416 = vxpose.xlu0.c.b16.cont [3/8] %v1703_v5, 128  ;;  %1629 = vmatprep.subr.bf16.mxu1 %v1717_v15  ;;  %v1724_v26 = vld [vmem:[%s2022_s1 + $0x18] sm:$0xff]   ;;  %v1726_v28 = vld [vmem:[%s2022_s1 + $0x10] sm:$0xff]   ;;  %v1728_v30 = vld [vmem:[%s2022_s1 + $0x8] sm:$0xff]  }
  0x28   : > { %400 = vxpose.xlu1.c.b16.cont [3/8] %v1704_v6, 128  ;;  %1495 = vmatpush3.bf16.msra.mxu0 %v1718_v16  ;;  %v1729_v31 = vld [vmem:[%s2022_s1 + $0x40] sm:$0xff]   ;;  %v222_v50 = vld [vmem:[#allocation2 + $0x30] sm:$0xff]  ;;  %v224_v60 = vld [vmem:[#allocation2 + $0x58] sm:$0xff] }
  0x29   : > { %1496 = vmatprep.subr.bf16.mxu0 %v1719_v17  ;;  %v1730_v32 = vld [vmem:[%s2022_s1] sm:$0xff]   ;;  %v225_v1 = vld [vmem:[#allocation2 + $0x18] sm:$0xff] }
  0x2a   : > { %1637 = vmatpush3.bf16.msra.mxu1 %v1718_v16  ;;  %v223_v55 = vld [vmem:[#allocation2] sm:$0xff] }
  0x2b   : > { %417 = vxpose.xlu0.c.b16.cont [4/8] %v1705_v7, 128  ;;  %1630 = vmatprep.subr.bf16.mxu1 %v1719_v17  ;;  %v226_v7 = vld [vmem:[#allocation2 + $0x50] sm:$0xff]  ;;  %v227_v17 = vld [vmem:[#allocation2 + $0x68] sm:$0xff] }
  0x2c   : > { %401 = vxpose.xlu1.c.b16.cont [4/8] %v1706_v8, 128  ;;  %1497 = vmatpush3.bf16.msra.mxu0 %v1720_v20 }
  0x2d   : > { %1498 = vmatprep.subr.bf16.mxu0 %v1721_v21 }
  0x2e   : > { %1638 = vmatpush3.bf16.msra.mxu1 %v1720_v20 }
  0x2f   : > { %418 = vxpose.xlu0.c.b16.cont [5/8] %v1707_v9, 128  ;;  %1631 = vmatprep.subr.bf16.mxu1 %v1721_v21  ;;  %v230_v9 = vld [vmem:[#allocation2 + $0x40] sm:$0xff] }
  0x30   : > { %402 = vxpose.xlu1.c.b16.cont [5/8] %v1708_v10, 128  ;;  %1499 = vmatpush3.bf16.msra.mxu0 %v1722_v24 }
  0x31   : > { %1500 = vmatprep.subr.bf16.mxu0 %v1723_v25 }
  0x32   : > { %1639 = vmatpush3.bf16.msra.mxu1 %v1722_v24 }
  0x33   : > { %419 = vxpose.xlu0.c.b16.cont [6/8] %v1709_v11, 128  ;;  %1632 = vmatprep.subr.bf16.mxu1 %v1723_v25 }
  0x34   : > { %403 = vxpose.xlu1.c.b16.cont [6/8] %v1710_v13, 128  ;;  %1501 = vmatpush3.bf16.msra.mxu0 %v1724_v26 }
  0x35   : > { %1502 = vmatprep.subr.bf16.mxu0 %v1725_v27 }
  0x36   : > { %1640 = vmatpush3.bf16.msra.mxu1 %v1724_v26 }
  0x37   : > { %420 = vxpose.xlu0.c.b16.cont [7/8] %v1711_v18, 128  ;;  %1633 = vmatprep.subr.bf16.mxu1 %v1725_v27  ;;  %v228_v27 = vld [vmem:[#allocation2 + $0x8] sm:$0xff] }
  0x38   : > { %404 = vxpose.xlu1.c.b16.cont [7/8] %v1712_v19, 128  ;;  %1503 = vmatpush3.bf16.msra.mxu0 %v1726_v28  ;;  %v231_v19 = vld [vmem:[#allocation2 + $0x20] sm:$0xff] }
  0x39   : > { %1504 = vmatprep.subr.bf16.mxu0 %v1727_v29 }
  0x3a   : > { %1641 = vmatpush3.bf16.msra.mxu1 %v1726_v28 }
  0x3b   : > { %421 = vxpose.xlu0.c.b16.end [8/8] %v1713_v22, 128  ;;  %1634 = vmatprep.subr.bf16.mxu1 %v1727_v29  ;;  %v232_v29 = vld [vmem:[#allocation2 + $0x10] sm:$0xff] }
  0x3c   : > { %405 = vxpose.xlu1.c.b16.end [8/8] %v1714_v23, 128  ;;  %1505 = vmatpush3.bf16.msra.mxu0 %v1728_v30 }
  0x3d   : > { %1506 = vmatprep.subr.bf16.mxu0 %v1729_v31 }
  0x3e   : > { %1642 = vmatpush3.bf16.msra.mxu1 %v1728_v30 }
  0x3f   : > { %1635 = vmatprep.subr.bf16.mxu1 %v1729_v31 }
  0x40   : > { %1507 = vmatpush3.bf16.msra.mxu0 %v1730_v32 }
  0x42   : > { %1643 = vmatpush3.bf16.msra.mxu1 %v1730_v32 }
  0x81   : > { %v422_v33 = vpop.trf.xlu0 }
  0x82   : > { %558 = vmatprep.mubr.bf16.mxu0 %v422_v33  ;;  %v406_v34 = vpop.trf.xlu1 }
  0x83   : > { %559 = vmatmul.mubr.bf16.vlgmr.msra.gmra.mxu0 %v406_v34 }
  0x85   : > { %v423_v35 = vpop.trf.xlu0 }
  0x86   : > { %566 = vmatprep.mubr.bf16.mxu0 %v423_v35  ;;  %v407_v36 = vpop.trf.xlu1 }
  0x89   : > { %v424_v37 = vpop.trf.xlu0 }
  0x8a   : > { %v408_v38 = vpop.trf.xlu1 }
  0x8b   : > { %567 = vmatmul.mubr.bf16.gmra.mxu0 %v407_v36 }
  0x8c   : > { %574 = vmatprep.mubr.bf16.mxu0 %v424_v37  ;;  %v229_v37 = vld [vmem:[#allocation2 + $0x48] sm:$0xff] }
  0x8d   : > { %v425_v39 = vpop.trf.xlu0 }
  0x8e   : > { %v409_v40 = vpop.trf.xlu1 }
  0x91   : > { %v426_v41 = vpop.trf.xlu0 }
  0x92   : > { %590 = vmatprep.mubr.bf16.mxu1 %v426_v41  ;;  %v410_v42 = vpop.trf.xlu1 }
  0x93   : > { %575 = vmatmul.mubr.bf16.gmra.mxu0 %v408_v38  ;;  %591 = vmatmul.mubr.bf16.vlgmr.msra.gmra.mxu1 %v410_v42 }
  0x94   : > { %582 = vmatprep.mubr.bf16.mxu0 %v425_v39  ;;  %v233_v39 = vld [vmem:[#allocation2 + $0x38] sm:$0xff] }
  0x95   : > { %v427_v43 = vpop.trf.xlu0 }
  0x96   : > { %598 = vmatprep.mubr.bf16.mxu1 %v427_v43  ;;  %v411_v44 = vpop.trf.xlu1 }
  0x99   : > { %v428_v45 = vpop.trf.xlu0 }
  0x9a   : > { %v412_v46 = vpop.trf.xlu1 }
  0x9b   : > { %583 = vmatmul.mubr.bf16.gmra.mxu0 %v409_v40  ;;  %599 = vmatmul.mubr.bf16.gmra.mxu1 %v411_v44 }
  0x9c   : > { %606 = vmatprep.mubr.bf16.mxu1 %v428_v45 }
  0x9d   : > { %v429_v47 = vpop.trf.xlu0 }
  0x9e   : > { %v413_v48 = vpop.trf.xlu1 }
  0xa3   : > { %607 = vmatmul.mubr.bf16.gmra.mxu1 %v412_v46  ;;  %v234_v46 = vld [vmem:[#allocation2 + $0x60] sm:$0xff] }
  0xa4   : > { %614 = vmatprep.mubr.bf16.mxu1 %v429_v47 }
  0xab   : > { %615 = vmatmul.mubr.bf16.gmra.mxu1 %v413_v48 }
 0x143   : > { %v1508_v49 = vpop.f32.mrf.mxu0 }
 0x145   : > { %v1509_v51 = vpop.f32.mrf.mxu0 }
 0x146   : > { %v1510_v52 = vadd.f32 %v1509_v51, %v1508_v49  ;;  %v235_v51 = vld [vmem:[#allocation2 + $0x70] sm:$0xff] }
 0x147   : > { %v1511_v53 = vpop.f32.mrf.mxu0 }
 0x148   : > { %v623_v54 = vadd.f32 %v1510_v52, %v222_v50 }
 0x149   : > { %v1512_v56 = vpop.f32.mrf.mxu0 }
 0x14a   : > { %639 = vst [vmem:[#allocation2 + $0x30] sm:$0xff] %v623_v54  ;;  %v1513_v57 = vadd.f32 %v1512_v56, %v1511_v53  ;;  %v236_v56 = vld [vmem:[#allocation2 + $0x78] sm:$0xff] }
 0x14b   : > { %v1514_v58 = vpop.f32.mrf.mxu0 }
 0x14c   : > { %v624_v59 = vadd.f32 %v1513_v57, %v223_v55 }
 0x14d   : > { %v1515_v61 = vpop.f32.mrf.mxu0 }
 0x14e   : > { %640 = vst [vmem:[#allocation2] sm:$0xff] %v624_v59  ;;  %v1516_v62 = vadd.f32 %v1515_v61, %v1514_v58  ;;  %v237_v61 = vld [vmem:[#allocation2 + $0x28] sm:$0xff] }
 0x14f   : > { %v1517_v63 = vpop.f32.mrf.mxu0 }
 0x150   : > { %v625_v0 = vadd.f32 %v1516_v62, %v224_v60 }
 0x151   : > { %v1518_v2 = vpop.f32.mrf.mxu0 }
 0x152   : > { %641 = vst [vmem:[#allocation2 + $0x58] sm:$0xff] %v625_v0  ;;  %v1519_v3 = vadd.f32 %v1518_v2, %v1517_v63 }
 0x153   : > { %v1520_v4 = vpop.f32.mrf.mxu0  ;;  %v1532_v5 = vpop.f32.mrf.mxu1 }
 0x154   : > { %v626_v6 = vadd.f32 %v1519_v3, %v225_v1 }
 0x155   : > { %v1521_v8 = vpop.f32.mrf.mxu0  ;;  %v1533_v10 = vpop.f32.mrf.mxu1 }
 0x156   : > { %642 = vst [vmem:[#allocation2 + $0x18] sm:$0xff] %v626_v6  ;;  %v1522_v11 = vadd.f32 %v1521_v8, %v1520_v4  ;;  %v1534_v12 = vadd.f32 %v1533_v10, %v1532_v5 }
 0x157   : > { %v1523_v13 = vpop.f32.mrf.mxu0  ;;  %v1535_v14 = vpop.f32.mrf.mxu1 }
 0x158   : > { %v627_v15 = vadd.f32 %v1522_v11, %v226_v7  ;;  %v631_v16 = vadd.f32 %v1534_v12, %v230_v9 }
 0x159   : > { %v1524_v18 = vpop.f32.mrf.mxu0  ;;  %v1536_v20 = vpop.f32.mrf.mxu1 }
 0x15a   : > { %643 = vst [vmem:[#allocation2 + $0x50] sm:$0xff] %v627_v15  ;;  %647 = vst [vmem:[#allocation2 + $0x40] sm:$0xff] %v631_v16  ;;  %v1525_v21 = vadd.f32 %v1524_v18, %v1523_v13  ;;  %v1537_v22 = vadd.f32 %v1536_v20, %v1535_v14 }
 0x15b   : > { %v1526_v23 = vpop.f32.mrf.mxu0  ;;  %v1538_v24 = vpop.f32.mrf.mxu1 }
 0x15c   : > { %v628_v25 = vadd.f32 %v1525_v21, %v227_v17  ;;  %v632_v26 = vadd.f32 %v1537_v22, %v231_v19 }
 0x15d   : > { %v1527_v28 = vpop.f32.mrf.mxu0  ;;  %v1539_v30 = vpop.f32.mrf.mxu1 }
 0x15e   : > { %644 = vst [vmem:[#allocation2 + $0x68] sm:$0xff] %v628_v25  ;;  %648 = vst [vmem:[#allocation2 + $0x20] sm:$0xff] %v632_v26  ;;  %v1528_v31 = vadd.f32 %v1527_v28, %v1526_v23  ;;  %v1540_v32 = vadd.f32 %v1539_v30, %v1538_v24 }
 0x15f   : > { %v1529_v33 = vpop.f32.mrf.mxu0  ;;  %v1541_v34 = vpop.f32.mrf.mxu1 }
 0x160   : > { %v629_v35 = vadd.f32 %v1528_v31, %v228_v27  ;;  %v633_v36 = vadd.f32 %v1540_v32, %v232_v29 }
 0x161   : > { %v1530_v38 = vpop.f32.mrf.mxu0  ;;  %v1542_v40 = vpop.f32.mrf.mxu1 }
 0x162   : > { %645 = vst [vmem:[#allocation2 + $0x8] sm:$0xff] %v629_v35  ;;  %649 = vst [vmem:[#allocation2 + $0x10] sm:$0xff] %v633_v36  ;;  %v1531_v41 = vadd.f32 %v1530_v38, %v1529_v33  ;;  %v1543_v42 = vadd.f32 %v1542_v40, %v1541_v34 }
 0x163   : > { %v1544_v43 = vpop.f32.mrf.mxu1 }
 0x164   : > { %v630_v44 = vadd.f32 %v1531_v41, %v229_v37  ;;  %v634_v45 = vadd.f32 %v1543_v42, %v233_v39 }
 0x165   : > { %v1545_v47 = vpop.f32.mrf.mxu1 }
 0x166   : > { %646 = vst [vmem:[#allocation2 + $0x48] sm:$0xff] %v630_v44  ;;  %650 = vst [vmem:[#allocation2 + $0x38] sm:$0xff] %v634_v45  ;;  %v1546_v48 = vadd.f32 %v1545_v47, %v1544_v43 }
 0x167   : > { %v1547_v49 = vpop.f32.mrf.mxu1 }
 0x168   : > { %v635_v50 = vadd.f32 %v1546_v48, %v234_v46 }
 0x169   : > { %v1548_v52 = vpop.f32.mrf.mxu1 }
 0x16a   : > { %651 = vst [vmem:[#allocation2 + $0x60] sm:$0xff] %v635_v50  ;;  %v1549_v53 = vadd.f32 %v1548_v52, %v1547_v49 }
 0x16b   : > { %v1550_v54 = vpop.f32.mrf.mxu1 }
 0x16c   : > { %v636_v55 = vadd.f32 %v1549_v53, %v235_v51 }
 0x16d   : > { %v1551_v57 = vpop.f32.mrf.mxu1 }
 0x16e   : > { %652 = vst [vmem:[#allocation2 + $0x70] sm:$0xff] %v636_v55  ;;  %v1552_v58 = vadd.f32 %v1551_v57, %v1550_v54 }
 0x16f   : > { %v1553_v59 = vpop.f32.mrf.mxu1 }
 0x170   : > { %v637_v60 = vadd.f32 %v1552_v58, %v236_v56 }
 0x171   : > { %v1554_v62 = vpop.f32.mrf.mxu1 }
 0x172   : > { %653 = vst [vmem:[#allocation2 + $0x78] sm:$0xff] %v637_v60  ;;  %v1555_v63 = vadd.f32 %v1554_v62, %v1553_v59 }
 0x174   : > { %v638_v0 = vadd.f32 %v1555_v63, %v237_v61 }
 0x176   : > { %654 = vst [vmem:[#allocation2 + $0x28] sm:$0xff] %v638_v0 }
 0x177 PF: > { %p655_p6 = scmp.eq.s32.totalorder %s1797_s9, 1 }
 0x178   : > { %v660_v1 = vld [vmem:[#allocation2 + $0x30] sm:$0xff] (%p655_p6)  ;;  %v661_v2 = vld [vmem:[#allocation2] sm:$0xff] (%p655_p6)  ;;  %v662_v3 = vld [vmem:[#allocation2 + $0x58] sm:$0xff] (%p655_p6) }
 0x179   : > { %659 = sbr.rel (!%p655_p6) target bundleno = 385 (0x181), region = 40  ;;  %v1448_v4 = vpack.c.bf16 (%p655_p6), %v661_v2, %v660_v1  ;;  %v663_v5 = vld [vmem:[#allocation2 + $0x18] sm:$0xff] (%p655_p6)  ;;  %v664_v6 = vld [vmem:[#allocation2 + $0x50] sm:$0xff] (%p655_p6)  ;;  %v665_v7 = vld [vmem:[#allocation2 + $0x68] sm:$0xff] (%p655_p6) }
 0x17a   : > { %v1453_v8 = vpack.c.bf16 (%p655_p6), %v663_v5, %v662_v3  ;;  %v1458_v9 = vpack.c.bf16 (%p655_p6), %v665_v7, %v664_v6  ;;  %v666_v10 = vld [vmem:[#allocation2 + $0x8] sm:$0xff] (%p655_p6)  ;;  %v668_v12 = vld [vmem:[#allocation2 + $0x40] sm:$0xff] (%p655_p6)  ;;  %v670_v15 = vld [vmem:[#allocation2 + $0x10] sm:$0xff] (%p655_p6) }
 0x17b   : > { %v667_v11 = vld [vmem:[#allocation2 + $0x48] sm:$0xff] (%p655_p6)  ;;  %1449 = vst [vmem:[#allocation3] sm:$0xff] (%p655_p6), %v1448_v4   ;;  %v669_v14 = vld [vmem:[#allocation2 + $0x20] sm:$0xff] (%p655_p6)  ;;  %v671_v16 = vld [vmem:[#allocation2 + $0x38] sm:$0xff] (%p655_p6) }
 0x17c   : > { %v1463_v13 = vpack.c.bf16 (%p655_p6), %v667_v11, %v666_v10  ;;  %1485 = vst [vmem:[#allocation3 + $0x8] sm:$0xff] (%p655_p6), %v1453_v8   ;;  %1486 = vst [vmem:[#allocation3 + $0x10] sm:$0xff] (%p655_p6), %v1458_v9   ;;  %v1468_v17 = vpack.c.bf16 (%p655_p6), %v669_v14, %v668_v12  ;;  %v1473_v18 = vpack.c.bf16 (%p655_p6), %v671_v16, %v670_v15  ;;  %v672_v19 = vld [vmem:[#allocation2 + $0x60] sm:$0xff] (%p655_p6)  ;;  %v673_v20 = vld [vmem:[#allocation2 + $0x70] sm:$0xff] (%p655_p6) }
 0x17d   : > { %v674_v21 = vld [vmem:[#allocation2 + $0x78] sm:$0xff] (%p655_p6)  ;;  %v1478_v22 = vpack.c.bf16 (%p655_p6), %v673_v20, %v672_v19  ;;  %v675_v23 = vld [vmem:[#allocation2 + $0x28] sm:$0xff] (%p655_p6) }
 0x17e   : > { %1487 = vst [vmem:[#allocation3 + $0x18] sm:$0xff] %v1463_v13   ;;  %1488 = vst [vmem:[#allocation3 + $0x20] sm:$0xff] %v1468_v17   ;;  %v1483_v24 = vpack.c.bf16 %v675_v23, %v674_v21 }
 0x17f   : > { %1489 = vst [vmem:[#allocation3 + $0x28] sm:$0xff] %v1473_v18   ;;  %1490 = vst [vmem:[#allocation3 + $0x30] sm:$0xff] %v1478_v22  }
 0x180   : > { %1491 = vst [vmem:[#allocation3 + $0x38] sm:$0xff] %v1483_v24  }
 0x181 PF: > { %p1398_p7 = scmp.ne.s32.totalorder %s1797_s9, 1 }
 0x183   : > { %758 = sbr.rel (%p1398_p7) target bundleno = 653 (0x28d), region = 44 }
 0x188   : > { %v1731_v25 = vld [vmem:[#allocation3 + $0x38] sm:$0xff]   ;;  %v1732_v26 = vld [vmem:[#allocation3 + $0x30] sm:$0xff]   ;;  %v1733_v27 = vld [vmem:[#allocation3 + $0x28] sm:$0xff]  }
 0x189   : > { %1580 = vmatprep.subr.bf16.mxu0 %v1731_v25  ;;  %1644 = vmatprep.subr.bf16.mxu1 %v1731_v25  ;;  %v1734_v28 = vld [vmem:[#allocation3 + $0x20] sm:$0xff]   ;;  %v1735_v31 = vld [vmem:[#allocation3 + $0x18] sm:$0xff]   ;;  %v1736_v32 = vld [vmem:[#allocation3 + $0x10] sm:$0xff]  }
 0x18a   : > { %1581 = vmatpush3.bf16.msra.mxu0 %v1731_v25  ;;  %1652 = vmatpush3.bf16.msra.mxu1 %v1731_v25  ;;  %v1739_v29 = vld [vmem:[%s2021_s0] sm:$0xff]   ;;  %v1737_v33 = vld [vmem:[#allocation3 + $0x8] sm:$0xff]   ;;  %v1743_v37 = vld [vmem:[%s2021_s0 + $0x10] sm:$0xff]  }
 0x18b   : > { %1582 = vmatprep.subr.bf16.mxu0 %v1732_v26  ;;  %1645 = vmatprep.subr.bf16.mxu1 %v1732_v26  ;;  %v1740_v30 = vld [vmem:[%s2021_s0 + $0x40] sm:$0xff]   ;;  %v1741_v35 = vld [vmem:[%s2021_s0 + $0x8] sm:$0xff]   ;;  %v1744_v38 = vld [vmem:[%s2021_s0 + $0x50] sm:$0xff]  }
 0x18c   : > { %1596 = vmatprep.mubr.bf16.mxu0 %v1739_v29  ;;  %1612 = vmatprep.mubr.bf16.mxu1 %v1740_v30  ;;  %v1738_v34 = vld [vmem:[#allocation3] sm:$0xff]   ;;  %v1742_v36 = vld [vmem:[%s2021_s0 + $0x48] sm:$0xff]   ;;  %v1745_v39 = vld [vmem:[%s2021_s0 + $0x18] sm:$0xff]  }
 0x18d   : > { %v1746_v40 = vld [vmem:[%s2021_s0 + $0x58] sm:$0xff]   ;;  %v1747_v41 = vld [vmem:[%s2021_s0 + $0x20] sm:$0xff]   ;;  %v1749_v43 = vld [vmem:[%s2021_s0 + $0x28] sm:$0xff]  }
 0x18e   : > { %1583 = vmatpush3.bf16.msra.mxu0 %v1732_v26  ;;  %1653 = vmatpush3.bf16.msra.mxu1 %v1732_v26  ;;  %v1748_v42 = vld [vmem:[%s2021_s0 + $0x60] sm:$0xff]   ;;  %v1750_v44 = vld [vmem:[%s2021_s0 + $0x68] sm:$0xff]   ;;  %v1751_v45 = vld [vmem:[%s2021_s0 + $0x30] sm:$0xff]  }
 0x18f   : > { %1584 = vmatprep.subr.bf16.mxu0 %v1733_v27  ;;  %1646 = vmatprep.subr.bf16.mxu1 %v1733_v27  ;;  %v1752_v46 = vld [vmem:[%s2021_s0 + $0x70] sm:$0xff]   ;;  %v1753_v47 = vld [vmem:[%s2021_s0 + $0x38] sm:$0xff]  }
 0x190   : > { %v1754_v48 = vld [vmem:[%s2021_s0 + $0x78] sm:$0xff]  }
 0x192   : > { %1585 = vmatpush3.bf16.msra.mxu0 %v1733_v27  ;;  %1654 = vmatpush3.bf16.msra.mxu1 %v1733_v27 }
 0x193   : > { %1586 = vmatprep.subr.bf16.mxu0 %v1734_v28  ;;  %1647 = vmatprep.subr.bf16.mxu1 %v1734_v28 }
 0x196   : > { %1587 = vmatpush3.bf16.msra.mxu0 %v1734_v28  ;;  %1655 = vmatpush3.bf16.msra.mxu1 %v1734_v28 }
 0x197   : > { %1588 = vmatprep.subr.bf16.mxu0 %v1735_v31  ;;  %1648 = vmatprep.subr.bf16.mxu1 %v1735_v31 }
 0x19a   : > { %1589 = vmatpush3.bf16.msra.mxu0 %v1735_v31  ;;  %1656 = vmatpush3.bf16.msra.mxu1 %v1735_v31 }
 0x19b   : > { %1590 = vmatprep.subr.bf16.mxu0 %v1736_v32  ;;  %1649 = vmatprep.subr.bf16.mxu1 %v1736_v32 }
 0x19e   : > { %1591 = vmatpush3.bf16.msra.mxu0 %v1736_v32  ;;  %1657 = vmatpush3.bf16.msra.mxu1 %v1736_v32 }
 0x19f   : > { %1592 = vmatprep.subr.bf16.mxu0 %v1737_v33  ;;  %1650 = vmatprep.subr.bf16.mxu1 %v1737_v33 }
 0x1a2   : > { %1593 = vmatpush3.bf16.msra.mxu0 %v1737_v33  ;;  %1658 = vmatpush3.bf16.msra.mxu1 %v1737_v33 }
 0x1a3   : > { %1594 = vmatprep.subr.bf16.mxu0 %v1738_v34  ;;  %1651 = vmatprep.subr.bf16.mxu1 %v1738_v34 }
 0x1a6   : > { %1595 = vmatpush3.bf16.msra.mxu0 %v1738_v34  ;;  %1659 = vmatpush3.bf16.msra.mxu1 %v1738_v34 }
 0x1a9   : > { %1597 = vmatmul.mubr.bf16.vlgmr.msra.gmra.mxu0 %v1741_v35  ;;  %1613 = vmatmul.mubr.bf16.vlgmr.msra.gmra.mxu1 %v1742_v36 }
 0x1aa   : > { %1600 = vmatprep.mubr.bf16.mxu0 %v1743_v37  ;;  %1616 = vmatprep.mubr.bf16.mxu1 %v1744_v38 }
 0x1b1   : > { %1601 = vmatmul.mubr.bf16.gmra.mxu0 %v1745_v39  ;;  %1617 = vmatmul.mubr.bf16.gmra.mxu1 %v1746_v40 }
 0x1b2   : > { %1604 = vmatprep.mubr.bf16.mxu0 %v1747_v41  ;;  %1620 = vmatprep.mubr.bf16.mxu1 %v1748_v42 }
 0x1b9   : > { %1605 = vmatmul.mubr.bf16.gmra.mxu0 %v1749_v43  ;;  %1621 = vmatmul.mubr.bf16.gmra.mxu1 %v1750_v44 }
 0x1ba   : > { %1608 = vmatprep.mubr.bf16.mxu0 %v1751_v45  ;;  %1624 = vmatprep.mubr.bf16.mxu1 %v1752_v46 }
 0x1c1   : > { %1609 = vmatmul.mubr.bf16.gmra.mxu0 %v1753_v47  ;;  %1625 = vmatmul.mubr.bf16.gmra.mxu1 %v1754_v48 }
 0x269   : > { %v1598_v49 = vpop.f32.mrf.mxu0  ;;  %v1614_v50 = vpop.f32.mrf.mxu1 }
 0x26a   : > { %vm1114_vm0 = vcmp.ge.f32.partialorder %v1598_v49, 0.0  ;;  %v1146_v51 = vmul.f32 0.2, %v1598_v49  ;;  %vm1130_vm1 = vcmp.ge.f32.partialorder %v1614_v50, 0.0  ;;  %v1162_v52 = vmul.f32 0.2, %v1614_v50 }
 0x26b   : > { %v985_v53 = vpop.f32.mrf.mxu0  ;;  %v1049_v54 = vpop.f32.mrf.mxu1 }
 0x26c   : > { %v1178_v55 = vsel %vm1114_vm0, %v1598_v49, %v1146_v51  ;;  %v1194_v56 = vsel %vm1130_vm1, %v1614_v50, %v1162_v52  ;;  %vm1112_vm2 = vcmp.ge.f32.partialorder %v985_v53, 0.0  ;;  %v1144_v57 = vmul.f32 0.2, %v985_v53 }
 0x26d   : > { %1210 = vst [vmem:[#allocation4 + $0x10] sm:$0xff] %v1178_v55  ;;  %1226 = vst [vmem:[#allocation4 + $0x90] sm:$0xff] %v1194_v56  ;;  %vm1128_vm3 = vcmp.ge.f32.partialorder %v1049_v54, 0.0  ;;  %v1160_v58 = vmul.f32 0.2, %v1049_v54  ;;  %v1599_v59 = vpop.f32.mrf.mxu0  ;;  %v1615_v60 = vpop.f32.mrf.mxu1 }
 0x26e   : > { %v1176_v61 = vsel %vm1112_vm2, %v985_v53, %v1144_v57  ;;  %vm1115_vm4 = vcmp.ge.f32.partialorder %v1599_v59, 0.0  ;;  %v1147_v62 = vmul.f32 0.2, %v1599_v59  ;;  %vm1131_vm5 = vcmp.ge.f32.partialorder %v1615_v60, 0.0 }
 0x26f   : > { %1208 = vst [vmem:[#allocation4] sm:$0xff] %v1176_v61  ;;  %v1192_v63 = vsel %vm1128_vm3, %v1049_v54, %v1160_v58  ;;  %v1163_v0 = vmul.f32 0.2, %v1615_v60  ;;  %v988_v1 = vpop.f32.mrf.mxu0  ;;  %v1052_v2 = vpop.f32.mrf.mxu1 }
 0x270   : > { %1224 = vst [vmem:[#allocation4 + $0x80] sm:$0xff] %v1192_v63  ;;  %v1179_v3 = vsel %vm1115_vm4, %v1599_v59, %v1147_v62  ;;  %vm1113_vm6 = vcmp.ge.f32.partialorder %v988_v1, 0.0  ;;  %v1145_v4 = vmul.f32 0.2, %v988_v1  ;;  %vm1129_vm7 = vcmp.ge.f32.partialorder %v1052_v2, 0.0 }
 0x271   : > { %1211 = vst [vmem:[#allocation4 + $0x18] sm:$0xff] %v1179_v3  ;;  %v1195_v5 = vsel %vm1131_vm5, %v1615_v60, %v1163_v0  ;;  %v1161_v6 = vmul.f32 0.2, %v1052_v2  ;;  %v1602_v7 = vpop.f32.mrf.mxu0  ;;  %v1618_v8 = vpop.f32.mrf.mxu1 }
 0x272   : > { %1227 = vst [vmem:[#allocation4 + $0x98] sm:$0xff] %v1195_v5  ;;  %v1177_v9 = vsel %vm1113_vm6, %v988_v1, %v1145_v4  ;;  %vm1118_vm8 = vcmp.ge.f32.partialorder %v1602_v7, 0.0  ;;  %v1150_v10 = vmul.f32 0.2, %v1602_v7  ;;  %vm1134_vm9 = vcmp.ge.f32.partialorder %v1618_v8, 0.0 }
 0x273   : > { %1209 = vst [vmem:[#allocation4 + $0x8] sm:$0xff] %v1177_v9  ;;  %v1193_v11 = vsel %vm1129_vm7, %v1052_v2, %v1161_v6  ;;  %v1166_v12 = vmul.f32 0.2, %v1618_v8  ;;  %v1001_v13 = vpop.f32.mrf.mxu0  ;;  %v1065_v14 = vpop.f32.mrf.mxu1 }
 0x274   : > { %1225 = vst [vmem:[#allocation4 + $0x88] sm:$0xff] %v1193_v11  ;;  %v1182_v15 = vsel %vm1118_vm8, %v1602_v7, %v1150_v10  ;;  %vm1116_vm10 = vcmp.ge.f32.partialorder %v1001_v13, 0.0  ;;  %v1148_v16 = vmul.f32 0.2, %v1001_v13  ;;  %vm1132_vm11 = vcmp.ge.f32.partialorder %v1065_v14, 0.0 }
 0x275   : > { %1214 = vst [vmem:[#allocation4 + $0x30] sm:$0xff] %v1182_v15  ;;  %v1198_v17 = vsel %vm1134_vm9, %v1618_v8, %v1166_v12  ;;  %v1164_v18 = vmul.f32 0.2, %v1065_v14  ;;  %v1603_v19 = vpop.f32.mrf.mxu0  ;;  %v1619_v20 = vpop.f32.mrf.mxu1 }
 0x276   : > { %1230 = vst [vmem:[#allocation4 + $0xb0] sm:$0xff] %v1198_v17  ;;  %v1180_v21 = vsel %vm1116_vm10, %v1001_v13, %v1148_v16  ;;  %vm1119_vm12 = vcmp.ge.f32.partialorder %v1603_v19, 0.0  ;;  %v1151_v22 = vmul.f32 0.2, %v1603_v19  ;;  %vm1135_vm13 = vcmp.ge.f32.partialorder %v1619_v20, 0.0 }
 0x277   : > { %1212 = vst [vmem:[#allocation4 + $0x20] sm:$0xff] %v1180_v21  ;;  %v1196_v23 = vsel %vm1132_vm11, %v1065_v14, %v1164_v18  ;;  %v1167_v24 = vmul.f32 0.2, %v1619_v20  ;;  %v1004_v25 = vpop.f32.mrf.mxu0  ;;  %v1068_v26 = vpop.f32.mrf.mxu1 }
 0x278   : > { %1228 = vst [vmem:[#allocation4 + $0xa0] sm:$0xff] %v1196_v23  ;;  %v1183_v27 = vsel %vm1119_vm12, %v1603_v19, %v1151_v22  ;;  %vm1117_vm14 = vcmp.ge.f32.partialorder %v1004_v25, 0.0  ;;  %v1149_v28 = vmul.f32 0.2, %v1004_v25  ;;  %vm1133_vm15 = vcmp.ge.f32.partialorder %v1068_v26, 0.0 }
 0x279   : > { %1215 = vst [vmem:[#allocation4 + $0x38] sm:$0xff] %v1183_v27  ;;  %v1199_v29 = vsel %vm1135_vm13, %v1619_v20, %v1167_v24  ;;  %v1165_v30 = vmul.f32 0.2, %v1068_v26  ;;  %v1606_v31 = vpop.f32.mrf.mxu0  ;;  %v1622_v32 = vpop.f32.mrf.mxu1 }
 0x27a   : > { %1231 = vst [vmem:[#allocation4 + $0xb8] sm:$0xff] %v1199_v29  ;;  %v1181_v33 = vsel %vm1117_vm14, %v1004_v25, %v1149_v28  ;;  %vm1122_vm0 = vcmp.ge.f32.partialorder %v1606_v31, 0.0  ;;  %v1154_v34 = vmul.f32 0.2, %v1606_v31  ;;  %vm1138_vm1 = vcmp.ge.f32.partialorder %v1622_v32, 0.0 }
 0x27b   : > { %1213 = vst [vmem:[#allocation4 + $0x28] sm:$0xff] %v1181_v33  ;;  %v1197_v35 = vsel %vm1133_vm15, %v1068_v26, %v1165_v30  ;;  %v1170_v36 = vmul.f32 0.2, %v1622_v32  ;;  %v1017_v37 = vpop.f32.mrf.mxu0  ;;  %v1081_v38 = vpop.f32.mrf.mxu1 }
 0x27c   : > { %1229 = vst [vmem:[#allocation4 + $0xa8] sm:$0xff] %v1197_v35  ;;  %v1186_v39 = vsel %vm1122_vm0, %v1606_v31, %v1154_v34  ;;  %vm1120_vm2 = vcmp.ge.f32.partialorder %v1017_v37, 0.0  ;;  %v1152_v40 = vmul.f32 0.2, %v1017_v37  ;;  %vm1136_vm3 = vcmp.ge.f32.partialorder %v1081_v38, 0.0 }
 0x27d   : > { %1218 = vst [vmem:[#allocation4 + $0x50] sm:$0xff] %v1186_v39  ;;  %v1202_v41 = vsel %vm1138_vm1, %v1622_v32, %v1170_v36  ;;  %v1168_v42 = vmul.f32 0.2, %v1081_v38  ;;  %v1607_v43 = vpop.f32.mrf.mxu0  ;;  %v1623_v44 = vpop.f32.mrf.mxu1 }
 0x27e   : > { %1234 = vst [vmem:[#allocation4 + $0xd0] sm:$0xff] %v1202_v41  ;;  %v1184_v45 = vsel %vm1120_vm2, %v1017_v37, %v1152_v40  ;;  %vm1123_vm4 = vcmp.ge.f32.partialorder %v1607_v43, 0.0  ;;  %v1155_v46 = vmul.f32 0.2, %v1607_v43  ;;  %vm1139_vm5 = vcmp.ge.f32.partialorder %v1623_v44, 0.0 }
 0x27f   : > { %1216 = vst [vmem:[#allocation4 + $0x40] sm:$0xff] %v1184_v45  ;;  %v1200_v47 = vsel %vm1136_vm3, %v1081_v38, %v1168_v42  ;;  %v1171_v48 = vmul.f32 0.2, %v1623_v44  ;;  %v1020_v49 = vpop.f32.mrf.mxu0  ;;  %v1084_v50 = vpop.f32.mrf.mxu1 }
 0x280   : > { %1232 = vst [vmem:[#allocation4 + $0xc0] sm:$0xff] %v1200_v47  ;;  %v1187_v51 = vsel %vm1123_vm4, %v1607_v43, %v1155_v46  ;;  %vm1121_vm6 = vcmp.ge.f32.partialorder %v1020_v49, 0.0  ;;  %v1153_v52 = vmul.f32 0.2, %v1020_v49  ;;  %vm1137_vm7 = vcmp.ge.f32.partialorder %v1084_v50, 0.0 }
 0x281   : > { %1219 = vst [vmem:[#allocation4 + $0x58] sm:$0xff] %v1187_v51  ;;  %v1203_v53 = vsel %vm1139_vm5, %v1623_v44, %v1171_v48  ;;  %v1169_v54 = vmul.f32 0.2, %v1084_v50  ;;  %v1610_v55 = vpop.f32.mrf.mxu0  ;;  %v1626_v56 = vpop.f32.mrf.mxu1 }
 0x282   : > { %1235 = vst [vmem:[#allocation4 + $0xd8] sm:$0xff] %v1203_v53  ;;  %v1185_v57 = vsel %vm1121_vm6, %v1020_v49, %v1153_v52  ;;  %vm1126_vm8 = vcmp.ge.f32.partialorder %v1610_v55, 0.0  ;;  %v1158_v58 = vmul.f32 0.2, %v1610_v55  ;;  %vm1142_vm9 = vcmp.ge.f32.partialorder %v1626_v56, 0.0 }
 0x283   : > { %1217 = vst [vmem:[#allocation4 + $0x48] sm:$0xff] %v1185_v57  ;;  %v1201_v59 = vsel %vm1137_vm7, %v1084_v50, %v1169_v54  ;;  %v1174_v60 = vmul.f32 0.2, %v1626_v56  ;;  %v1033_v61 = vpop.f32.mrf.mxu0  ;;  %v1097_v62 = vpop.f32.mrf.mxu1 }
 0x284   : > { %1233 = vst [vmem:[#allocation4 + $0xc8] sm:$0xff] %v1201_v59  ;;  %v1190_v63 = vsel %vm1126_vm8, %v1610_v55, %v1158_v58  ;;  %vm1124_vm10 = vcmp.ge.f32.partialorder %v1033_v61, 0.0  ;;  %v1156_v0 = vmul.f32 0.2, %v1033_v61  ;;  %vm1140_vm11 = vcmp.ge.f32.partialorder %v1097_v62, 0.0 }
 0x285   : > { %1222 = vst [vmem:[#allocation4 + $0x70] sm:$0xff] %v1190_v63  ;;  %v1206_v1 = vsel %vm1142_vm9, %v1626_v56, %v1174_v60  ;;  %v1172_v2 = vmul.f32 0.2, %v1097_v62  ;;  %v1611_v3 = vpop.f32.mrf.mxu0  ;;  %v1627_v4 = vpop.f32.mrf.mxu1 }
 0x286   : > { %1238 = vst [vmem:[#allocation4 + $0xf0] sm:$0xff] %v1206_v1  ;;  %v1188_v5 = vsel %vm1124_vm10, %v1033_v61, %v1156_v0  ;;  %vm1127_vm12 = vcmp.ge.f32.partialorder %v1611_v3, 0.0  ;;  %v1159_v6 = vmul.f32 0.2, %v1611_v3  ;;  %vm1143_vm13 = vcmp.ge.f32.partialorder %v1627_v4, 0.0 }
 0x287   : > { %1220 = vst [vmem:[#allocation4 + $0x60] sm:$0xff] %v1188_v5  ;;  %v1204_v7 = vsel %vm1140_vm11, %v1097_v62, %v1172_v2  ;;  %v1175_v8 = vmul.f32 0.2, %v1627_v4  ;;  %v1036_v9 = vpop.f32.mrf.mxu0  ;;  %v1100_v10 = vpop.f32.mrf.mxu1 }
 0x288   : > { %1236 = vst [vmem:[#allocation4 + $0xe0] sm:$0xff] %v1204_v7  ;;  %v1191_v11 = vsel %vm1127_vm12, %v1611_v3, %v1159_v6  ;;  %vm1125_vm14 = vcmp.ge.f32.partialorder %v1036_v9, 0.0  ;;  %v1157_v12 = vmul.f32 0.2, %v1036_v9  ;;  %vm1141_vm15 = vcmp.ge.f32.partialorder %v1100_v10, 0.0 }
 0x289   : > { %1223 = vst [vmem:[#allocation4 + $0x78] sm:$0xff] %v1191_v11  ;;  %v1207_v13 = vsel %vm1143_vm13, %v1627_v4, %v1175_v8  ;;  %v1173_v14 = vmul.f32 0.2, %v1100_v10 }
 0x28a   : > { %1239 = vst [vmem:[#allocation4 + $0xf8] sm:$0xff] %v1207_v13  ;;  %v1189_v15 = vsel %vm1125_vm14, %v1036_v9, %v1157_v12 }
 0x28b   : > { %1221 = vst [vmem:[#allocation4 + $0x68] sm:$0xff] %v1189_v15  ;;  %v1205_v16 = vsel %vm1141_vm15, %v1100_v10, %v1173_v14 }
 0x28c   : > { %1237 = vst [vmem:[#allocation4 + $0xe8] sm:$0xff] %v1205_v16 }
 0x28d PF: > { %p1998_p8 = scmp.eq.s32.totalorder %s1340_s12, 1  ;;  %s1808_s22 = smov [#allocation4]  }
 0x28e   : > { %s1255_s23 = sshll.u32 %s1808_s22, 4  ;;  %s1256_s23 = int_to_ptr.vmem [resolvable:$true] %s1255_s23 }
 0x28f   : > { %s1755_s24 = scalar_lea.vmem %s1256_s23, 4096  ;;  %s1761_s25 = scalar_lea.vmem %s1256_s23, 8192 }
 0x290   : > { %p1756_p9 = scmp.ne.s32.totalorder %s1256_s23, %s1755_s24  ;;  %p1762_p12 = scmp.lt.s32.totalorder %s1256_s23, %s1256_s23 }
 0x291   : > { %p1763_p13 = scmp.lt.s32.totalorder %s1761_s25, %s1755_s24 }
 0x292   : > { %p1757_p10 = pnand %p1756_p9, %p1998_p8 }
 0x293   : > { %p1764_p0 = por %p1763_p13, %p1762_p12 }
 0x294   : > { %p1758_p11 = pneg %p1757_p10 }
 0x296   : > { %p1765_p1 = pnand %p1764_p0, %p1758_p11 }
 0x298   : > { %1768 = shalt.err (!%p1765_p1)
}
 0x299   : > { %s1809_s26 = smov 128   ;;  %s1810_s12 = smov 8  }
 0x29a   : > { %1661 = dma.vmem_to_hbm [thread:$0]  (%p1998_p8), %s1256_s23, 4096, %s2023_s2, [#allocation5], %s1809_s26, %s1809_s26, %s1810_s12  }
 0x29b PF: > { %p1669_p2 = scmp.ge.s32.totalorder %s1805_s11, 2  ;;  %p1670_p3 = scmp.eq.s32.totalorder %s1341_s13, 1 }
 0x29d   : > { %p1665_p4 = pnand %p1670_p3, %p1669_p2 }
 0x29f   : > { %p1666_p5 = pneg %p1665_p4 }
 0x2a1   : > { %1792 = dma.done.wait (%p1666_p5), [#allocation5], 4096  }
 0x2a2   : > { %1794 = vsyncadd (%p1666_p5), [#allocation5], 4294963200  ;;  %s15_s11 = sadd.s32 1, %s1805_s11   ;;  %s2025_s9 = smov %s1801_s10 }
 0x2a3   : > { %p12_p6 = scmp.ge.s32.totalorder %s15_s11, 4   ;;  %s2026_s10 = smov %s2028_s14 }
 0x2a5   :  { %14 = sbr.rel (!%p12_p6) target bundleno = 3 (0x3), region = 82 }
 0x2aa   :  { %1276 = vsyncpa [#allocation5], 1 }
 0x2ab   :  { %1278 = vsyncpa [#allocation5 + $0x1], 1 }

</bundles_post_ra>
